<compile_context>
chip_gen: v6e
topology: v6e:2x2x1
jax: 0.10.0
libtpu: 0.0.40
codegen_flags: <defaults>
</compile_context>

<pallas_src>
import functools

import jax
import jax.numpy as jnp
from jax import lax
from jax.experimental import pallas as pl
from jax.experimental.pallas import tpu as pltpu

_LANES = 128
_VMEM_LIMIT = 32 * 1024 * 1024


def _round_up(x: int, m: int) -> int:
    return ((x + m - 1) // m) * m


def _cdiv(a: int, b: int) -> int:
    return -(-a // b)


def _sublane_multiple(dtype) -> int:
    # 8 sublanes for 32-bit, 16 for 16-bit (packed), 32 for 8-bit dtypes.
    return 8 * max(1, 4 // jnp.dtype(dtype).itemsize)


def _is_v7x() -> bool:
    try:
        kind = jax.devices()[0].device_kind.lower()
    except Exception:
        return False
    return ("v7" in kind) or ("7x" in kind)


def _smooth_l1_elem(pred_block, target_block):
    d = pred_block.astype(jnp.float32) - target_block.astype(jnp.float32)
    abs_d = jnp.abs(d)
    # SmoothL1 with beta = 1.0 (PyTorch default):
    #   0.5 * d^2      if |d| < 1
    #   |d| - 0.5      otherwise
    return jnp.where(abs_d < 1.0, 0.5 * d * d, abs_d - 0.5)


def _masked_elem(pred_ref, target_ref, *, tile_rows, valid_rows, needs_mask):
    elem = _smooth_l1_elem(pred_ref[...], target_ref[...])
    if needs_mask:
        # The last grid block may extend past the true row count; Pallas pads
        # boundary input blocks with unspecified data, so zero it by row index.
        row = (lax.broadcasted_iota(jnp.int32, elem.shape, 0)
               + pl.program_id(0) * tile_rows)
        elem = jnp.where(row < valid_rows, elem, 0.0)
    return elem


def _accum_kernel(pred_ref, target_ref, out_ref, *, tile_rows, valid_rows,
                  needs_mask):
    # Single-TC path: one (1,1) SMEM accumulator shared by every grid step.
    @pl.when(pl.program_id(0) == 0)
    def _():
        out_ref[0, 0] = jnp.float32(0.0)

    elem = _masked_elem(pred_ref, target_ref, tile_rows=tile_rows,
                        valid_rows=valid_rows, needs_mask=needs_mask)
    out_ref[0, 0] += jnp.sum(elem)


def _partial_kernel(pred_ref, target_ref, out_ref, *, tile_rows, valid_rows,
                    needs_mask):
    # v7x path: independent per-tile partial sums -> "parallel" grid axis.
    elem = _masked_elem(pred_ref, target_ref, tile_rows=tile_rows,
                        valid_rows=valid_rows, needs_mask=needs_mask)
    out_ref[0, 0] = jnp.sum(elem)


def _smooth_l1_sum(pred: jax.Array, target: jax.Array, tile_rows, mode):
    n = int(pred.size)
    if (pred.dtype != target.dtype
            or pred.dtype not in (jnp.float32, jnp.bfloat16, jnp.float16)):
        pred = pred.astype(jnp.float32)
        target = target.astype(jnp.float32)
    dtype = pred.dtype
    sub = _sublane_multiple(dtype)

    flat_p = pred.reshape(-1)
    flat_t = target.reshape(-1)

    # Lane-dense layout: rows of 128 lanes.  Only pad to lane alignment
    # (<= 127 zero elements, each contributing exactly 0 to the sum); the
    # ragged last *tile* is masked in-kernel instead of padded, so no
    # full-array pad copy is made when N is already lane-aligned.
    rows = max(1, _cdiv(n, _LANES))
    padded_n = rows * _LANES
    if padded_n != n:
        flat_p = jnp.pad(flat_p, (0, padded_n - n))
        flat_t = jnp.pad(flat_t, (0, padded_n - n))
    p2 = flat_p.reshape(rows, _LANES)
    t2 = flat_t.reshape(rows, _LANES)

    use_parallel = (mode == "parallel") or (mode == "auto" and _is_v7x())

    if tile_rows is None:
        # ~2 MiB/input tile (f32) on v5e/v6e, ~4 MiB on v7x; halved for bf16.
        tile_rows = 8192 if _is_v7x() else 4096
    tile_rows = max(sub, _round_up(int(tile_rows), sub))
    if use_parallel and rows >= 2 * sub:
        # Keep >= 2 tiles so both v7x TensorCores get work on the parallel axis.
        tile_rows = min(tile_rows, _round_up(_cdiv(rows, 2), sub))
    if tile_rows >= rows:
        # Single block spanning the full array (allowed for any row count).
        tile_rows = rows

    num_tiles = _cdiv(rows, tile_rows)
    needs_mask = (rows % tile_rows) != 0

    in_specs = [
        pl.BlockSpec((tile_rows, _LANES), lambda i: (i, 0)),
        pl.BlockSpec((tile_rows, _LANES), lambda i: (i, 0)),
    ]

    if use_parallel:
        kernel = functools.partial(_partial_kernel, tile_rows=tile_rows,
                                   valid_rows=rows, needs_mask=needs_mask)
        partials = pl.pallas_call(
            kernel,
            out_shape=jax.ShapeDtypeStruct((num_tiles, 1), jnp.float32),
            grid=(num_tiles,),
            in_specs=in_specs,
            out_specs=pl.BlockSpec((1, 1), lambda i: (i, 0),
                                   memory_space=pltpu.SMEM),
            compiler_params=pltpu.CompilerParams(
                dimension_semantics=("parallel",),
                vmem_limit_bytes=_VMEM_LIMIT,
            ),
        )(p2, t2)
        # Tiny reduction of per-tile partial sums.
        return jnp.sum(partials)

    kernel = functools.partial(_accum_kernel, tile_rows=tile_rows,
                               valid_rows=rows, needs_mask=needs_mask)
    out = pl.pallas_call(
        kernel,
        out_shape=jax.ShapeDtypeStruct((1, 1), jnp.float32),
        grid=(num_tiles,),
        in_specs=in_specs,
        out_specs=pl.BlockSpec((1, 1), lambda i: (0, 0),
                               memory_space=pltpu.SMEM),
        compiler_params=pltpu.CompilerParams(
            dimension_semantics=("arbitrary",),
            vmem_limit_bytes=_VMEM_LIMIT,
        ),
    )(p2, t2)
    return out[0, 0]


def pred_loss(pred: jax.Array, target: jax.Array, *, tile_rows=None,
              mode: str = "auto"):
    """JAX/Pallas equivalent of PredLoss.forward.

    pred:   (N, 1) float
    target: (N, 1) float
    Returns dict with 'num_reg', 'reg_loss', 'loss'.
    """
    assert pred.shape == target.shape and pred.ndim == 2 and pred.shape[1] == 1
    n = pred.shape[0]

    reg_loss = _smooth_l1_sum(pred, target, tile_rows, mode)

    output = {}
    output["num_reg"] = n
    output["reg_loss"] = reg_loss
    output["loss"] = reg_loss / (n + 1e-10)
    return output


def _ref_smooth_l1_sum(pred, target):
    d = pred.astype(jnp.float32) - target.astype(jnp.float32)
    ad = jnp.abs(d)
    return jnp.sum(jnp.where(ad < 1.0, 0.5 * d * d, ad - 0.5))


if __name__ == "__main__":
    key = jax.random.PRNGKey(0)
    keys = jax.random.split(key, 8)

    def check(out, pred, target, n, rtol=1e-5, atol=1e-5):
        jax.block_until_ready(out["loss"])
        ref = _ref_smooth_l1_sum(pred, target)
        assert jnp.allclose(out["reg_loss"], ref, rtol=rtol, atol=atol)
        assert jnp.allclose(out["loss"], ref / (n + 1e-10), rtol=rtol, atol=atol)

    # Case 1: small N, single full-array block, auto tile / mode selection.
    N1 = 256
    p1 = jax.random.normal(keys[0], (N1, 1), dtype=jnp.float32) * 2.0
    t1 = jax.random.normal(keys[1], (N1, 1), dtype=jnp.float32) * 2.0
    check(pred_loss(p1, t1), p1, t1, N1)

    # Case 2: multi-tile single-accumulator path ("arbitrary" grid axis).
    N2 = 2048
    p2 = jax.random.normal(keys[2], (N2, 1), dtype=jnp.float32) * 2.0
    t2 = jax.random.normal(keys[3], (N2, 1), dtype=jnp.float32) * 2.0
    check(pred_loss(p2, t2, tile_rows=8, mode="accum"), p2, t2, N2)

    # Case 3: multi-tile per-tile-partials path ("parallel" axis, v7x style).
    check(pred_loss(p2, t2, tile_rows=8, mode="parallel"), p2, t2, N2)

    # Case 4: N not lane/tile aligned -> zero-pad to 128 + in-kernel tail mask.
    N4 = 3000  # 24 rows of 128; two 16-row tiles, last one partial/masked
    p4 = jax.random.normal(keys[4], (N4, 1), dtype=jnp.float32) * 2.0
    t4 = jax.random.normal(keys[5], (N4, 1), dtype=jnp.float32) * 2.0
    check(pred_loss(p4, t4, tile_rows=16, mode="accum"), p4, t4, N4)
    check(pred_loss(p4, t4, tile_rows=16, mode="parallel"), p4, t4, N4)

    # Case 5: bf16 inputs loaded at native width, upcast to f32 in-kernel.
    N5 = 4096
    p5 = (jax.random.normal(keys[6], (N5, 1), dtype=jnp.float32) * 2.0
          ).astype(jnp.bfloat16)
    t5 = (jax.random.normal(keys[7], (N5, 1), dtype=jnp.float32) * 2.0
          ).astype(jnp.bfloat16)
    check(pred_loss(p5, t5), p5, t5, N5, rtol=1e-4, atol=1e-4)

    print("KERNEL_OK")
</pallas_src>

<mosaic_0001>
module attributes {stable_mosaic.version = 11 : i64} {
  func.func @_accum_kernel(%arg0: i32, %arg1: memref<2x128xf32, #tpu.memory_space<vmem>>, %arg2: memref<2x128xf32, #tpu.memory_space<vmem>>, %arg3: memref<1x1xf32, #tpu.memory_space<smem>>) attributes {dimension_semantics = [#tpu.dimension_semantics<arbitrary>], iteration_bounds = array<i64: 1>, scalar_prefetch = 0 : i64, scratch_operands = 0 : i64, tpu.core_type = #tpu.core_type<tc>, window_params = [{transform_indices = @transform_0, window_bounds = array<i64: 2, 128>}, {transform_indices = @transform_1, window_bounds = array<i64: 2, 128>}, {transform_indices = @transform_2, window_bounds = array<i64: 1, 1>}]} {
    %c0_i32 = arith.constant 0 : i32
    %0 = arith.cmpi eq, %arg0, %c0_i32 : i32
    %1 = arith.extui %0 : i1 to i32
    %c0_i32_0 = arith.constant 0 : i32
    %2 = arith.cmpi ne, %1, %c0_i32_0 : i32
    scf.if %2 {
      %cst_11 = arith.constant 0.000000e+00 : f32
      %c0_12 = arith.constant 0 : index
      %c0_13 = arith.constant 0 : index
      %22 = memref.load %arg3[%c0_12, %c0_13] : memref<1x1xf32, #tpu.memory_space<smem>>
      memref.store %cst_11, %arg3[%c0_12, %c0_13] : memref<1x1xf32, #tpu.memory_space<smem>>
    } else {
    }
    %c0 = arith.constant 0 : index
    %c0_1 = arith.constant 0 : index
    %3 = vector.load %arg1[%c0, %c0_1] : memref<2x128xf32, #tpu.memory_space<vmem>>, vector<2x128xf32>
    %c0_2 = arith.constant 0 : index
    %c0_3 = arith.constant 0 : index
    %4 = vector.load %arg2[%c0_2, %c0_3] : memref<2x128xf32, #tpu.memory_space<vmem>>, vector<2x128xf32>
    %5 = arith.subf %3, %4 : vector<2x128xf32>
    %6 = math.absf %5 : vector<2x128xf32>
    %cst = arith.constant 1.000000e+00 : f32
    %7 = vector.broadcast %cst : f32 to vector<2x128xf32>
    %8 = arith.cmpf olt, %6, %7 : vector<2x128xf32>
    %cst_4 = arith.constant 5.000000e-01 : f32
    %9 = vector.broadcast %cst_4 : f32 to vector<2x128xf32>
    %10 = arith.mulf %9, %5 : vector<2x128xf32>
    %11 = arith.mulf %10, %5 : vector<2x128xf32>
    %cst_5 = arith.constant 5.000000e-01 : f32
    %12 = vector.broadcast %cst_5 : f32 to vector<2x128xf32>
    %13 = arith.subf %6, %12 : vector<2x128xf32>
    %14 = arith.select %8, %11, %13 : vector<2x128xi1>, vector<2x128xf32>
    %c0_6 = arith.constant 0 : index
    %c0_7 = arith.constant 0 : index
    %15 = memref.load %arg3[%c0_6, %c0_7] : memref<1x1xf32, #tpu.memory_space<smem>>
    %16 = vector.shape_cast %14 : vector<2x128xf32> to vector<1x2x128xf32>
    %cst_8 = arith.constant dense<0.000000e+00> : vector<1xf32>
    %17 = vector.multi_reduction <add>, %16, %cst_8 [1, 2] : vector<1x2x128xf32> to vector<1xf32>
    %18 = vector.shape_cast %17 : vector<1xf32> to vector<1x1x1xf32>
    %19 = vector.extract %18[0, 0, 0] : f32 from vector<1x1x1xf32>
    %20 = arith.addf %15, %19 : f32
    %c0_9 = arith.constant 0 : index
    %c0_10 = arith.constant 0 : index
    %21 = memref.load %arg3[%c0_9, %c0_10] : memref<1x1xf32, #tpu.memory_space<smem>>
    memref.store %20, %arg3[%c0_9, %c0_10] : memref<1x1xf32, #tpu.memory_space<smem>>
    return
  }
  func.func @transform_0(%arg0: i32) -> (i32, i32) {
    %c0_i32 = arith.constant 0 : i32
    %c0_i32_0 = arith.constant 0 : i32
    return %arg0, %c0_i32 : i32, i32
  }
  func.func @transform_1(%arg0: i32) -> (i32, i32) {
    %c0_i32 = arith.constant 0 : i32
    %c0_i32_0 = arith.constant 0 : i32
    return %arg0, %c0_i32 : i32, i32
  }
  func.func @transform_2(%arg0: i32) -> (i32, i32) {
    %c0_i32 = arith.constant 0 : i32
    %c0_i32_0 = arith.constant 0 : i32
    %c0_i32_1 = arith.constant 0 : i32
    return %c0_i32, %c0_i32_0 : i32, i32
  }
}

</mosaic_0001>

<bundles_post_ra>
// kernel: tpu_custom_call.1
= control target key start
LH: loop header
LB: loop body
LE: loop exit
PB: predicated region body
PF: predicated region fallthrough
CT: control target
= control target key end

     0   :  { %7 = vsyncpa [#allocation3], 0  ;;  %s169_s0 = inlined_call_operand.hbm [shape: f32[2,128], index: 0, kind: input, shape index: {}]   ;;  %s170_s1 = inlined_call_operand.hbm [shape: f32[2,128], index: 1, kind: input, shape index: {}]   ;;  %s171_s2 = inlined_call_operand.hbm [shape: f32[1,1], index: 2, kind: output, shape index: {}]  }
   0x1   :  { %8 = vsyncpa [#allocation6], 0 }
   0x2   :  { %9 = vsyncpa [#allocation4], 0  ;;  %s142_s9 = smov [#allocation2]   ;;  %s143_s11 = smov [#allocation5]  }
   0x3   :  { %s16_s10 = sshll.u32 %s142_s9, 4  ;;  %s26_s12 = sshll.u32 %s143_s11, 4  ;;  %s17_s10 = int_to_ptr.vmem [resolvable:$true] %s16_s10  ;;  %s27_s12 = int_to_ptr.vmem [resolvable:$true] %s26_s12 }
   0x4   :  { %s96_s13 = scalar_lea.vmem %s17_s10, 32  ;;  %p101_p1 = scmp.lt.s32.totalorder %s17_s10, %s17_s10 }
   0x5   :  { %p97_p0 = scmp.ne.s32.totalorder %s17_s10, %s96_s13  ;;  %p102_p2 = scmp.lt.s32.totalorder %s96_s13, %s96_s13 }
   0x7   :  { %p103_p3 = por %p102_p2, %p101_p1 }
   0x9   :  { %p104_p4 = pnand %p103_p3, %p97_p0 }
   0xb   :  { %107 = shalt.err (!%p104_p4)
}
   0xc   :  { %19 = dma.hbm_to_vmem [thread:$0]  %s169_s0, 32, %s17_s10, [#allocation3]  }
   0xd   :  { %s116_s16 = scalar_lea.vmem %s27_s12, 32  ;;  %p121_p6 = scmp.lt.s32.totalorder %s27_s12, %s27_s12 }
   0xe   :  { %p117_p5 = scmp.ne.s32.totalorder %s27_s12, %s116_s16  ;;  %p122_p7 = scmp.lt.s32.totalorder %s116_s16, %s116_s16 }
  0x10   :  { %p123_p8 = por %p122_p7, %p121_p6 }
  0x12   :  { %p124_p9 = pnand %p123_p8, %p117_p5 }
  0x14   :  { %127 = shalt.err (!%p124_p9)
}
  0x15   :  { %29 = dma.hbm_to_vmem [thread:$0]  %s170_s1, 32, %s27_s12, [#allocation6]  }
  0x16   :  { %136 = dma.done.wait [#allocation3], 32  }
  0x17   :  { %137 = vsyncadd [#allocation3], 4294967264 }
  0x18   :  { %138 = dma.done.wait [#allocation6], 32  }
  0x19   :  { %139 = vsyncadd [#allocation6], 4294967264  ;;  %v42_v0 = vld [vmem:[#allocation2] sm:$0x3]  ;;  %v43_v1 = vld [vmem:[#allocation5] sm:$0x3] }
  0x1a   :  { %v44_v2 = vsub.f32 %v42_v0, %v43_v1  ;;  %vm52_vm1 = vcmask 1041408   ;;  %s144_s1 = smov [#allocation7]  }
  0x1c   :  { %v45_v3 = vand.u32 2147483647, %v44_v2  ;;  %v47_v4 = vmul.f32 0.5, %v44_v2 }
  0x1e   :  { %vm46_vm0 = vcmp.lt.f32.partialorder %v45_v3, 1.0  ;;  %v48_v5 = vmul.f32 %v47_v4, %v44_v2  ;;  %v81_v6 = vadd.f32 -0.5, %v45_v3 }
  0x20   :  { %v50_v7 = vsel %vm46_vm0, %v48_v5, %v81_v6 }
  0x21   :  { %v53_v8 = vsel %vm52_vm1, %v50_v7, 0.0 }
  0x22   :  { %54 = vadd.xlane.f32.xlu0 %v53_v8 }
  0xab   :  { %v55_v9 = vpop.xlane.xlu0 %54 }
  0xac   :  { %v56_v10 = vrot.slane %v55_v9, 4 }
  0xae   :  { %v57_v11 = vadd.f32 %v56_v10, %v55_v9 }
  0xb0   :  { %v58_v12 = vrot.slane %v57_v11, 2 }
  0xb2   :  { %v59_v13 = vadd.f32 %v58_v12, %v57_v11 }
  0xb4   :  { %v60_v14 = vrot.slane %v59_v13, 1 }
  0xb6   :  { %v61_v15 = vadd.f32 %v60_v14, %v59_v13 }
  0xb8   :  { %82 = vpush %v61_v15 }
  0xe9   :  { %s83_s0 = spop %82 }
  0xea   :  { %65 = sst [smem:[#allocation7]] %s83_s0 }
  0xeb   :  { %73 = dma.smem_to_hbm %s144_s1, 16, %s171_s2, [#allocation4]  }
  0xec   :  { %140 = dma.done.wait [#allocation4], 16  }
  0xed   :  { %141 = vsyncadd [#allocation4], 4294967280 }
  0xee   :  { %77 = sfence }
  0xef   :  { %78 = vsyncpa [#allocation3], 1 }
  0xf0   :  { %79 = vsyncpa [#allocation6], 1 }
  0xf1   :  { %80 = vsyncpa [#allocation4], 1 }

</bundles_post_ra>
